<compile_context>
chip_gen: v5e
topology: v5e:2x2
jax: 0.10.0
libtpu: 0.0.40
codegen_flags: <defaults>
</compile_context>

<pallas_src>
import jax
import jax.numpy as jnp
from jax.experimental import pallas as pl
from jax.experimental.pallas import tpu as pltpu


def rnn_classifier_kernel(x_ref, w_gates_ref, b_gates_ref, wfc_ref, bfc_ref,
                          out_ref):
    H = w_gates_ref.shape[1] // 6             # hidden_dim (128)
    x = x_ref[...]                            # (B, Dp) bf16

    # One fused MXU matmul for both directions; column layout (each block H=128
    # wide, lane-aligned): [i_fwd, g_fwd, o_fwd, i_bwd, g_bwd, o_bwd]
    gates = (jnp.dot(x, w_gates_ref[...], preferred_element_type=jnp.float32)
             + b_gates_ref[...])              # (B, 6H) f32

    def h_from(base):
        i_g = jax.nn.sigmoid(gates[:, base + 0 * H: base + 1 * H])
        g_g = jnp.tanh(gates[:, base + 1 * H: base + 2 * H])
        o_g = jax.nn.sigmoid(gates[:, base + 2 * H: base + 3 * H])
        # c0 = 0  =>  c = sigmoid(i) * tanh(g);  h = sigmoid(o) * tanh(c)
        return o_g * jnp.tanh(i_g * g_g)      # (B, H) f32

    h_fwd = h_from(0)                         # hidden[-2]
    h_bwd = h_from(3 * H)                     # hidden[-1]

    # fc on concat([h_fwd, h_bwd], axis=1): lane-aligned concat (both H = 128
    # wide) + a single (B, 2H) @ (2H, 128) MXU matmul. Padded classes carry
    # bias = -inf.
    h_cat = jnp.concatenate([h_fwd, h_bwd], axis=1).astype(wfc_ref.dtype)
    logits = (jnp.dot(h_cat, wfc_ref[...], preferred_element_type=jnp.float32)
              + bfc_ref[...])                 # (B, 128) f32

    # softmax over dim=1: padded lanes contribute exp(-inf) == 0, so the
    # normalization over the 3 real classes is unchanged.
    m = jnp.max(logits, axis=1, keepdims=True)
    e = jnp.exp(logits - m)
    s = jnp.sum(e, axis=1, keepdims=True)
    out_ref[...] = (e * pl.reciprocal(s, approx=True)).astype(out_ref.dtype)


def rnn_classifier_forward(x, params):
    B, D = x.shape
    H = params["w_ih_f"].shape[0] // 4
    O = params["w_fc"].shape[0]
    OP = 128                                    # lane-dense padded output width
    Dp = ((D + 127) // 128) * 128               # 300 -> 384, lane-aligned K dim

    # ---- wrapper-side (plain JAX) weight prep -------------------------------
    def igo_rows(w):                            # (4H, .) -> (3H, .): drop forget
        return jnp.concatenate([w[0:H], w[2 * H:3 * H], w[3 * H:4 * H]], axis=0)

    # Fused gate weights for both directions: (Dp, 6H) bf16, zero-padded rows.
    w_gates = jnp.concatenate(
        [igo_rows(params["w_ih_f"]).T, igo_rows(params["w_ih_b"]).T], axis=1)
    w_gates = jnp.pad(w_gates, ((0, Dp - D), (0, 0))).astype(jnp.bfloat16)

    # Pre-summed biases (b_ih + b_hh), same i/g/o selection, f32: (1, 6H).
    b_gates = jnp.concatenate(
        [igo_rows(params["b_ih_f"] + params["b_hh_f"]),
         igo_rows(params["b_ih_b"] + params["b_hh_b"])],
        axis=0).reshape(1, 6 * H).astype(jnp.float32)

    # fc weight: (O, 2H) -> (2H, OP), zero-padded columns; padded bias = -inf.
    wfc = jnp.pad(params["w_fc"].T, ((0, 0), (0, OP - O))).astype(jnp.bfloat16)
    bfc = jnp.full((1, OP), -jnp.inf, jnp.float32).at[0, :O].set(
        params["b_fc"].astype(jnp.float32))

    x_p = jnp.pad(x, ((0, 0), (0, Dp - D))).astype(jnp.bfloat16)

    vmem = pl.BlockSpec(memory_space=pltpu.MemorySpace.VMEM)
    out_padded = pl.pallas_call(
        rnn_classifier_kernel,
        out_shape=jax.ShapeDtypeStruct((B, OP), jnp.float32),
        in_specs=[vmem] * 5,
        out_specs=vmem,
    )(x_p, w_gates, b_gates, wfc, bfc)

    return out_padded[:, :O]


def reference_forward(x, params):
    """Pure-JAX f32 reference with the exact PyTorch-equivalent math."""
    H = params["w_ih_f"].shape[0] // 4

    def lstm_dir(w_ih, b_ih, b_hh):
        gates = x @ w_ih.T + b_ih + b_hh
        i = jax.nn.sigmoid(gates[:, 0 * H:1 * H])
        g = jnp.tanh(gates[:, 2 * H:3 * H])
        o = jax.nn.sigmoid(gates[:, 3 * H:4 * H])
        return o * jnp.tanh(i * g)

    h = jnp.concatenate(
        [lstm_dir(params["w_ih_f"], params["b_ih_f"], params["b_hh_f"]),
         lstm_dir(params["w_ih_b"], params["b_ih_b"], params["b_hh_b"])],
        axis=1)
    logits = h @ params["w_fc"].T + params["b_fc"]
    return jax.nn.softmax(logits, axis=1)


if __name__ == "__main__":
    # Shapes implied by the module: input_dim = 300 (word2vec vector_size),
    # hidden_dim = 128, output_dim = 3; small batch = 8.
    B, D, H, O = 8, 300, 128, 3

    key = jax.random.PRNGKey(0)
    keys = jax.random.split(key, 11)
    k_lstm = 1.0 / jnp.sqrt(jnp.float32(H))
    k_fc = 1.0 / jnp.sqrt(jnp.float32(2 * H))

    def u(kk, shape, scale):
        return jax.random.uniform(kk, shape, jnp.float32, -scale, scale)

    # Deterministic parameter init mirroring nn.LSTM / nn.Linear shapes.
    # w_hh_* are created (as in the module) but are mathematically irrelevant
    # for seq_len == 1 with zero initial hidden state.
    params = dict(
        w_ih_f=u(keys[0], (4 * H, D), k_lstm),
        w_hh_f=u(keys[1], (4 * H, H), k_lstm),
        b_ih_f=u(keys[2], (4 * H,), k_lstm),
        b_hh_f=u(keys[3], (4 * H,), k_lstm),
        w_ih_b=u(keys[4], (4 * H, D), k_lstm),
        w_hh_b=u(keys[5], (4 * H, H), k_lstm),
        b_ih_b=u(keys[6], (4 * H,), k_lstm),
        b_hh_b=u(keys[7], (4 * H,), k_lstm),
        w_fc=u(keys[8], (O, 2 * H), k_fc),
        b_fc=u(keys[9], (O,), k_fc),
    )

    x = jax.random.normal(keys[10], (B, D), jnp.float32)

    out = rnn_classifier_forward(x, params)
    jax.block_until_ready(out)

    ref = reference_forward(x, params)

    assert out.shape == (B, O)
    # rows sum to 1 (approx reciprocal + bf16 matmul tolerance)
    assert bool(jnp.all(jnp.abs(jnp.sum(out, axis=1) - 1.0) < 5e-3))
    # matches f32 reference within bf16 matmul tolerance
    assert bool(jnp.all(jnp.abs(out - ref) < 5e-2))
    print("KERNEL_OK")
</pallas_src>

<mosaic_0001>
module attributes {stable_mosaic.version = 11 : i64} {
  func.func @rnn_classifier_kernel(%arg0: memref<8x384xbf16, #tpu.memory_space<vmem>>, %arg1: memref<384x768xbf16, #tpu.memory_space<vmem>>, %arg2: memref<1x768xf32, #tpu.memory_space<vmem>>, %arg3: memref<256x128xbf16, #tpu.memory_space<vmem>>, %arg4: memref<1x128xf32, #tpu.memory_space<vmem>>, %arg5: memref<8x128xf32, #tpu.memory_space<vmem>>) attributes {dimension_semantics = [], scalar_prefetch = 0 : i64, scratch_operands = 0 : i64, tpu.core_type = #tpu.core_type<tc>} {
    %c0 = arith.constant 0 : index
    %c0_0 = arith.constant 0 : index
    %0 = vector.load %arg0[%c0, %c0_0] : memref<8x384xbf16, #tpu.memory_space<vmem>>, vector<8x384xbf16>
    %c0_1 = arith.constant 0 : index
    %c0_2 = arith.constant 0 : index
    %1 = vector.load %arg1[%c0_1, %c0_2] : memref<384x768xbf16, #tpu.memory_space<vmem>>, vector<384x768xbf16>
    %cst = arith.constant dense<0.000000e+00> : vector<8x768xf32>
    %2 = tpu.matmul %0, %1, %cst {dimension_numbers = #tpu.dot_dimension_numbers<[1], [0], [0], [1], [0, 0, 1, 1], [], []>} : vector<8x384xbf16>, vector<384x768xbf16>, vector<8x768xf32> -> vector<8x768xf32>
    %c0_3 = arith.constant 0 : index
    %c0_4 = arith.constant 0 : index
    %3 = vector.load %arg2[%c0_3, %c0_4] : memref<1x768xf32, #tpu.memory_space<vmem>>, vector<1x768xf32>
    %4 = vector.broadcast %3 : vector<1x768xf32> to vector<8x768xf32>
    %5 = arith.addf %2, %4 : vector<8x768xf32>
    %6 = vector.extract_strided_slice %5 {offsets = [0, 0], sizes = [8, 128], strides = [1, 1]} : vector<8x768xf32> to vector<8x128xf32>
    %7 = arith.negf %6 : vector<8x128xf32>
    %8 = math.exp %7 : vector<8x128xf32>
    %cst_5 = arith.constant 1.000000e+00 : f32
    %9 = vector.broadcast %cst_5 : f32 to vector<8x128xf32>
    %10 = arith.addf %9, %8 : vector<8x128xf32>
    %11 = arith.divf %9, %10 : vector<8x128xf32>
    %12 = vector.extract_strided_slice %5 {offsets = [0, 128], sizes = [8, 128], strides = [1, 1]} : vector<8x768xf32> to vector<8x128xf32>
    %13 = math.tanh %12 : vector<8x128xf32>
    %14 = vector.extract_strided_slice %5 {offsets = [0, 256], sizes = [8, 128], strides = [1, 1]} : vector<8x768xf32> to vector<8x128xf32>
    %15 = arith.negf %14 : vector<8x128xf32>
    %16 = math.exp %15 : vector<8x128xf32>
    %cst_6 = arith.constant 1.000000e+00 : f32
    %17 = vector.broadcast %cst_6 : f32 to vector<8x128xf32>
    %18 = arith.addf %17, %16 : vector<8x128xf32>
    %19 = arith.divf %17, %18 : vector<8x128xf32>
    %20 = arith.mulf %11, %13 : vector<8x128xf32>
    %21 = math.tanh %20 : vector<8x128xf32>
    %22 = arith.mulf %19, %21 : vector<8x128xf32>
    %23 = vector.extract_strided_slice %5 {offsets = [0, 384], sizes = [8, 128], strides = [1, 1]} : vector<8x768xf32> to vector<8x128xf32>
    %24 = arith.negf %23 : vector<8x128xf32>
    %25 = math.exp %24 : vector<8x128xf32>
    %cst_7 = arith.constant 1.000000e+00 : f32
    %26 = vector.broadcast %cst_7 : f32 to vector<8x128xf32>
    %27 = arith.addf %26, %25 : vector<8x128xf32>
    %28 = arith.divf %26, %27 : vector<8x128xf32>
    %29 = vector.extract_strided_slice %5 {offsets = [0, 512], sizes = [8, 128], strides = [1, 1]} : vector<8x768xf32> to vector<8x128xf32>
    %30 = math.tanh %29 : vector<8x128xf32>
    %31 = vector.extract_strided_slice %5 {offsets = [0, 640], sizes = [8, 128], strides = [1, 1]} : vector<8x768xf32> to vector<8x128xf32>
    %32 = arith.negf %31 : vector<8x128xf32>
    %33 = math.exp %32 : vector<8x128xf32>
    %cst_8 = arith.constant 1.000000e+00 : f32
    %34 = vector.broadcast %cst_8 : f32 to vector<8x128xf32>
    %35 = arith.addf %34, %33 : vector<8x128xf32>
    %36 = arith.divf %34, %35 : vector<8x128xf32>
    %37 = arith.mulf %28, %30 : vector<8x128xf32>
    %38 = math.tanh %37 : vector<8x128xf32>
    %39 = arith.mulf %36, %38 : vector<8x128xf32>
    %40 = tpu.concatenate %22, %39 in 1 : vector<8x128xf32>, vector<8x128xf32> -> vector<8x256xf32>
    %41 = arith.truncf %40 : vector<8x256xf32> to vector<8x256xbf16>
    %c0_9 = arith.constant 0 : index
    %c0_10 = arith.constant 0 : index
    %42 = vector.load %arg3[%c0_9, %c0_10] : memref<256x128xbf16, #tpu.memory_space<vmem>>, vector<256x128xbf16>
    %cst_11 = arith.constant dense<0.000000e+00> : vector<8x128xf32>
    %43 = tpu.matmul %41, %42, %cst_11 {dimension_numbers = #tpu.dot_dimension_numbers<[1], [0], [0], [1], [0, 0, 1, 1], [], []>} : vector<8x256xbf16>, vector<256x128xbf16>, vector<8x128xf32> -> vector<8x128xf32>
    %c0_12 = arith.constant 0 : index
    %c0_13 = arith.constant 0 : index
    %44 = vector.load %arg4[%c0_12, %c0_13] : memref<1x128xf32, #tpu.memory_space<vmem>>, vector<1x128xf32>
    %45 = vector.broadcast %44 : vector<1x128xf32> to vector<8x128xf32>
    %46 = arith.addf %43, %45 : vector<8x128xf32>
    %cst_14 = arith.constant dense<0xFF800000> : vector<8xf32>
    %47 = vector.multi_reduction <maximumf>, %46, %cst_14 [1] : vector<8x128xf32> to vector<8xf32>
    %48 = vector.shape_cast %47 : vector<8xf32> to vector<8x1xf32>
    %49 = vector.broadcast %48 : vector<8x1xf32> to vector<8x128xf32>
    %50 = arith.subf %46, %49 : vector<8x128xf32>
    %51 = math.exp %50 : vector<8x128xf32>
    %cst_15 = arith.constant dense<0.000000e+00> : vector<8xf32>
    %52 = vector.multi_reduction <add>, %51, %cst_15 [1] : vector<8x128xf32> to vector<8xf32>
    %53 = vector.shape_cast %52 : vector<8xf32> to vector<8x1xf32>
    %54 = tpu.reciprocal %53 {approx = true} : vector<8x1xf32> -> vector<8x1xf32>
    %55 = vector.broadcast %54 : vector<8x1xf32> to vector<8x128xf32>
    %56 = arith.mulf %51, %55 : vector<8x128xf32>
    %c0_16 = arith.constant 0 : index
    %c0_17 = arith.constant 0 : index
    %57 = vector.load %arg5[%c0_16, %c0_17] : memref<8x128xf32, #tpu.memory_space<vmem>>, vector<8x128xf32>
    tpu.vector_store %arg5[%c0_16, %c0_17], %56 {strides = array<i32>} : memref<8x128xf32, #tpu.memory_space<vmem>>, vector<8x128xf32>,
    return
  }
}

</mosaic_0001>

<bundles_post_ra>
// kernel: tpu_custom_call.1
= control target key start
LH: loop header
LB: loop body
LE: loop exit
PB: predicated region body
PF: predicated region fallthrough
CT: control target
= control target key end

     0   :  { %10 = vsyncpa [#allocation3], 0  ;;  %s2537_s0 = inlined_call_operand.hbm [shape: bf16[8,384], index: 0, kind: input, shape index: {}]   ;;  %s2538_s1 = inlined_call_operand.hbm [shape: bf16[384,768], index: 1, kind: input, shape index: {}]   ;;  %s2539_s2 = inlined_call_operand.hbm [shape: f32[1,768], index: 2, kind: input, shape index: {}]   ;;  %s2540_s3 = inlined_call_operand.hbm [shape: bf16[256,128], index: 3, kind: input, shape index: {}]   ;;  %s2541_s4 = inlined_call_operand.vmem [shape: f32[1,128], index: 4, kind: input, shape index: {}]   ;;  %s2542_s5 = inlined_call_operand.hbm [shape: f32[8,128], index: 5, kind: output, shape index: {}]  }
   0x1   :  { %11 = vsyncpa [#allocation6], 0 }
   0x2   :  { %12 = vsyncpa [#allocation9], 0  ;;  %s29_s20 = sshll.u32 %s2538_s1, 4  ;;  %s30_s20 = int_to_ptr.hbm [resolvable:$true] %s29_s20 }
   0x3   :  { %13 = vsyncpa [#allocation4], 0  ;;  %s2448_s21 = smov [#allocation5]   ;;  %s19_s25 = sshll.u32 %s2537_s0, 4  ;;  %s20_s25 = int_to_ptr.hbm [resolvable:$true] %s19_s25 }
   0x4   :  { %s31_s22 = sshll.u32 %s2448_s21, 4  ;;  %s2449_s26 = smov 384   ;;  %s32_s22 = int_to_ptr.vmem [resolvable:$true] %s31_s22 }
   0x5   :  { %s2450_s27 = smov 24   ;;  %s2451_s28 = smov [#allocation2]  }
   0x6   :  { %37 = dma.hbm_to_vmem [thread:$0]  %s30_s20, 18432, %s32_s22, [#allocation6], %s2449_s26, %s2449_s26, %s2450_s27  }
   0x7   :  { %s21_s29 = sshll.u32 %s2451_s28, 4  ;;  %s43_s7 = sshll.u32 %s2539_s2, 4  ;;  %s22_s29 = int_to_ptr.vmem [resolvable:$true] %s21_s29  ;;  %s44_s7 = int_to_ptr.hbm [resolvable:$true] %s43_s7 }
   0x8   :  { %24 = dma.hbm_to_vmem [thread:$0]  %s20_s25, 192, %s22_s29, [#allocation3]  }
   0x9   :  { %s53_s9 = sshll.u32 %s2540_s3, 4  ;;  %s2452_s10 = smov [#allocation7]   ;;  %s54_s9 = int_to_ptr.hbm [resolvable:$true] %s53_s9 }
   0xa   :  { %s45_s11 = sshll.u32 %s2452_s10, 4  ;;  %s2453_s0 = smov [#allocation8]   ;;  %s46_s11 = int_to_ptr.vmem [resolvable:$true] %s45_s11 }
   0xb   :  { %48 = dma.hbm_to_vmem [thread:$0]  %s44_s7, 96, %s46_s11, [#allocation6]  }
   0xc   :  { %s55_s12 = sshll.u32 %s2453_s0, 4  ;;  %s2454_s13 = smov 64   ;;  %s56_s12 = int_to_ptr.vmem [resolvable:$true] %s55_s12 }
   0xd   :  { %s2455_s14 = smov 4  }
   0xe   :  { %61 = dma.hbm_to_vmem [thread:$0]  %s54_s9, 2048, %s56_s12, [#allocation9], %s2454_s13, %s2454_s13, %s2455_s14  }
   0xf   :  { %2440 = dma.done.wait [#allocation3], 192  }
  0x10   :  { %2441 = vsyncadd [#allocation3], 4294967104 }
  0x11   :  { %2442 = dma.done.wait [#allocation6], 18528  }
  0x12   :  { %2443 = vsyncadd [#allocation6], 4294948768 }
  0x13   :  { %2444 = dma.done.wait [#allocation9], 2048  }
  0x14   :  { %2445 = vsyncadd [#allocation9], 4294965248  ;;  %v1648_v0 = vld [vmem:[#allocation5 + $0x150] sm:$0xf]  ;;  %v2167_v1 = vld [vmem:[#allocation5 + $0x164] sm:$0xf0] }
  0x15   :  { %v1840_v2 = vld [vmem:[#allocation5 + $0x2d0] sm:$0xf]  ;;  %v1649_v3 = vor.u32 %v2167_v1, %v1648_v0  ;;  %v2215_v4 = vld [vmem:[#allocation5 + $0x2e4] sm:$0xf0]  ;;  %v1624_v5 = vld [vmem:[#allocation5 + $0x120] sm:$0xf] }
  0x16   :  { %v2161_v6 = vld [vmem:[#allocation5 + $0x134] sm:$0xf0]  ;;  %v1841_v7 = vor.u32 %v2215_v4, %v1840_v2  ;;  %v1816_v8 = vld [vmem:[#allocation5 + $0x2a0] sm:$0xf]  ;;  %v2032_v10 = vld [vmem:[#allocation5 + $0x450] sm:$0xf] }
  0x17   :  { %v2209_v9 = vld [vmem:[#allocation5 + $0x2b4] sm:$0xf0]  ;;  %971 = vmatpush.bf16.msra.mxu0 %v1649_v3  ;;  %v1625_v11 = vor.u32 %v2161_v6, %v1624_v5  ;;  %v2263_v12 = vld [vmem:[#allocation5 + $0x464] sm:$0xf0]  ;;  %v1600_v15 = vld [vmem:[#allocation5 + $0xf0] sm:$0xf] }
  0x18   :  { %984 = vmatpush.bf16.msra.mxu1 %v1841_v7  ;;  %v1817_v13 = vor.u32 %v2209_v9, %v1816_v8  ;;  %v2033_v14 = vor.u32 %v2263_v12, %v2032_v10  ;;  %v2155_v16 = vld [vmem:[#allocation5 + $0x104] sm:$0xf0]  ;;  %v2008_v17 = vld [vmem:[#allocation5 + $0x420] sm:$0xf]  ;;  %v1792_v18 = vld [vmem:[#allocation5 + $0x270] sm:$0xf] }
  0x19   :  { %v2203_v19 = vld [vmem:[#allocation5 + $0x284] sm:$0xf0]  ;;  %v2257_v20 = vld [vmem:[#allocation5 + $0x434] sm:$0xf0]  ;;  %v1984_v22 = vld [vmem:[#allocation5 + $0x3f0] sm:$0xf]  ;;  %v1601_v23 = vor.u32 %v2155_v16, %v1600_v15 }
  0x1a   :  { %997 = vmatpush.bf16.msra.mxu2 %v2033_v14  ;;  %v2009_v21 = vor.u32 %v2257_v20, %v2008_v17  ;;  %v2251_v24 = vld [vmem:[#allocation5 + $0x404] sm:$0xf0]  ;;  %v2164_v25 = vld [vmem:[#allocation5 + $0x154] sm:$0xf]  ;;  %v1650_v26 = vld [vmem:[#allocation5 + $0x168] sm:$0xf0]  ;;  %v1793_v27 = vor.u32 %v2203_v19, %v1792_v18 }
  0x1b   :  { %972 = vmatpush.bf16.msra.mxu0 %v1625_v11  ;;  %v1576_v28 = vld [vmem:[#allocation5 + $0xc0] sm:$0xf]  ;;  %v2149_v29 = vld [vmem:[#allocation5 + $0xd4] sm:$0xf0]  ;;  %v1653_v30 = vor.u32 %v2164_v25, %v1650_v26  ;;  %v1985_v33 = vor.u32 %v2251_v24, %v1984_v22  ;;  %v2158_v34 = vld [vmem:[#allocation5 + $0x124] sm:$0xf] }
  0x1c   :  { %985 = vmatpush.bf16.msra.mxu1 %v1817_v13  ;;  %v1768_v31 = vld [vmem:[#allocation5 + $0x240] sm:$0xf]  ;;  %v2197_v32 = vld [vmem:[#allocation5 + $0x254] sm:$0xf0]  ;;  %v1626_v35 = vld [vmem:[#allocation5 + $0x138] sm:$0xf0]  ;;  %v1577_v36 = vor.u32 %v2149_v29, %v1576_v28 }
  0x1d   :  { %1010 = vmatpush.bf16.msra.mxu3 %v1653_v30  ;;  %v1960_v37 = vld [vmem:[#allocation5 + $0x3c0] sm:$0xf]  ;;  %v2245_v38 = vld [vmem:[#allocation5 + $0x3d4] sm:$0xf0]  ;;  %v1629_v39 = vor.u32 %v2158_v34, %v1626_v35  ;;  %v1769_v40 = vor.u32 %v2197_v32, %v1768_v31  ;;  %v1552_v41 = vld [vmem:[#allocation5 + $0x90] sm:$0xf] }
  0x1e   :  { %998 = vmatpush.bf16.msra.mxu2 %v2009_v21  ;;  %v2143_v42 = vld [vmem:[#allocation5 + $0xa4] sm:$0xf0]  ;;  %v2152_v43 = vld [vmem:[#allocation5 + $0xf4] sm:$0xf]  ;;  %v1744_v44 = vld [vmem:[#allocation5 + $0x210] sm:$0xf]  ;;  %v1961_v47 = vor.u32 %v2245_v38, %v1960_v37 }
  0x1f   :  { %973 = vmatpush.bf16.msra.mxu0 %v1601_v23  ;;  %v2191_v45 = vld [vmem:[#allocation5 + $0x224] sm:$0xf0]  ;;  %v1602_v46 = vld [vmem:[#allocation5 + $0x108] sm:$0xf0]  ;;  %v1936_v48 = vld [vmem:[#allocation5 + $0x390] sm:$0xf]  ;;  %v1553_v50 = vor.u32 %v2143_v42, %v1552_v41 }
  0x20   :  { %986 = vmatpush.bf16.msra.mxu1 %v1793_v27  ;;  %v1605_v49 = vor.u32 %v2152_v43, %v1602_v46  ;;  %v2239_v51 = vld [vmem:[#allocation5 + $0x3a4] sm:$0xf0]  ;;  %v2146_v52 = vld [vmem:[#allocation5 + $0xc4] sm:$0xf]  ;;  %v1578_v53 = vld [vmem:[#allocation5 + $0xd8] sm:$0xf0]  ;;  %v1745_v54 = vor.u32 %v2191_v45, %v1744_v44 }
  0x21   :  { %1011 = vmatpush.bf16.msra.mxu3 %v1629_v39  ;;  %v1528_v55 = vld [vmem:[#allocation5 + $0x60] sm:$0xf]  ;;  %v2137_v56 = vld [vmem:[#allocation5 + $0x74] sm:$0xf0]  ;;  %v1937_v59 = vor.u32 %v2239_v51, %v1936_v48  ;;  %v1581_v61 = vor.u32 %v2146_v52, %v1578_v53  ;;  %v2140_v0 = vld [vmem:[#allocation5 + $0x94] sm:$0xf] }
  0x22   :  { %999 = vmatpush.bf16.msra.mxu2 %v1985_v33  ;;  %v1720_v57 = vld [vmem:[#allocation5 + $0x1e0] sm:$0xf]  ;;  %v2185_v58 = vld [vmem:[#allocation5 + $0x1f4] sm:$0xf0]  ;;  %v1529_v62 = vor.u32 %v2137_v56, %v1528_v55  ;;  %v1554_v1 = vld [vmem:[#allocation5 + $0xa8] sm:$0xf0] }
  0x23   :  { %974 = vmatpush.bf16.msra.mxu0 %v1577_v36  ;;  %v1912_v60 = vld [vmem:[#allocation5 + $0x360] sm:$0xf]  ;;  %v2233_v63 = vld [vmem:[#allocation5 + $0x374] sm:$0xf0]  ;;  %v1721_v2 = vor.u32 %v2185_v58, %v1720_v57  ;;  %v1504_v3 = vld [vmem:[#allocation5 + $0x30] sm:$0xf]  ;;  %v1557_v10 = vor.u32 %v2140_v0, %v1554_v1 }
  0x24   :  { %987 = vmatpush.bf16.msra.mxu1 %v1769_v40  ;;  %v2131_v4 = vld [vmem:[#allocation5 + $0x44] sm:$0xf0]  ;;  %v1696_v5 = vld [vmem:[#allocation5 + $0x1b0] sm:$0xf]  ;;  %v1913_v7 = vor.u32 %v2233_v63, %v1912_v60  ;;  %v1480_v8 = vld [vmem:[#allocation5] sm:$0xf] }
  0x25   :  { %1012 = vmatpush.bf16.msra.mxu3 %v1605_v49  ;;  %v2179_v6 = vld [vmem:[#allocation5 + $0x1c4] sm:$0xf0]  ;;  %v1888_v9 = vld [vmem:[#allocation5 + $0x330] sm:$0xf]  ;;  %v1505_v11 = vor.u32 %v2131_v4, %v1504_v3  ;;  %v2134_v13 = vld [vmem:[#allocation5 + $0x64] sm:$0xf] }
  0x26   :  { %1000 = vmatpush.bf16.msra.mxu2 %v1961_v47  ;;  %v2227_v12 = vld [vmem:[#allocation5 + $0x344] sm:$0xf0]  ;;  %v1530_v14 = vld [vmem:[#allocation5 + $0x78] sm:$0xf0]  ;;  %v1697_v15 = vor.u32 %v2179_v6, %v1696_v5  ;;  %v2125_v16 = vld [vmem:[#allocation5 + $0x14] sm:$0xf0] }
  0x27   :  { %975 = vmatpush.bf16.msra.mxu0 %v1553_v50  ;;  %v1672_v17 = vld [vmem:[#allocation5 + $0x180] sm:$0xf]  ;;  %v2173_v18 = vld [vmem:[#allocation5 + $0x194] sm:$0xf0]  ;;  %v2212_v19 = vld [vmem:[#allocation5 + $0x2d4] sm:$0xf]  ;;  %v1889_v22 = vor.u32 %v2227_v12, %v1888_v9  ;;  %v1533_v26 = vor.u32 %v2134_v13, %v1530_v14  ;;  %v1481_v27 = vor.u32 %v2125_v16, %v1480_v8 }
  0x28   :  { %988 = vmatpush.bf16.msra.mxu1 %v1745_v54  ;;  %v1842_v20 = vld [vmem:[#allocation5 + $0x2e8] sm:$0xf0]  ;;  %v2260_v21 = vld [vmem:[#allocation5 + $0x454] sm:$0xf]  ;;  %v1864_v24 = vld [vmem:[#allocation5 + $0x300] sm:$0xf]  ;;  %v1673_v30 = vor.u32 %v2173_v18, %v1672_v17 }
  0x29   :  { %1013 = vmatpush.bf16.msra.mxu3 %v1581_v61  ;;  %v2034_v23 = vld [vmem:[#allocation5 + $0x468] sm:$0xf0]  ;;  %v2221_v25 = vld [vmem:[#allocation5 + $0x314] sm:$0xf0]  ;;  %v2128_v28 = vld [vmem:[#allocation5 + $0x34] sm:$0xf]  ;;  %v1845_v31 = vor.u32 %v2212_v19, %v1842_v20 }
  0x2a   :  { %1001 = vmatpush.bf16.msra.mxu2 %v1937_v59  ;;  %v1506_v29 = vld [vmem:[#allocation5 + $0x48] sm:$0xf0]  ;;  %v2206_v32 = vld [vmem:[#allocation5 + $0x2a4] sm:$0xf]  ;;  %v1656_v33 = vld [vmem:[#allocation5 + $0x158] sm:$0xf]  ;;  %v2037_v35 = vor.u32 %v2260_v21, %v2034_v23  ;;  %v1865_v36 = vor.u32 %v2221_v25, %v1864_v24 }
  0x2b   :  { %976 = vmatpush.bf16.msra.mxu0 %v1529_v62  ;;  %v2168_v34 = vld [vmem:[#allocation5 + $0x16c] sm:$0xf0]  ;;  %v1818_v37 = vld [vmem:[#allocation5 + $0x2b8] sm:$0xf0]  ;;  %v80_v39 = vld [vmem:[#allocation2] sm:$0xff]  ;;  %v1509_v42 = vor.u32 %v2128_v28, %v1506_v29  ;;  %s2456_s15 = smov [#allocation10]  }
  0x2c   :  { %989 = vmatpush.bf16.msra.mxu1 %v1721_v2  ;;  %v81_v38 = vld [vmem:[#allocation2 + $0x8] sm:$0xf]  ;;  %v2254_v40 = vld [vmem:[#allocation5 + $0x424] sm:$0xf]  ;;  %v242_v44 = vunpack.c.l.b16 %v80_v39  ;;  %v243_v45 = vunpack.c.h.b16 %v80_v39  ;;  %v1657_v46 = vor.u32 %v2168_v34, %v1656_v33  ;;  %v1632_v47 = vld [vmem:[#allocation5 + $0x128] sm:$0xf]  ;;  %v1821_v50 = vor.u32 %v2206_v32, %v1818_v37 }
  0x2d   :  { %1014 = vmatpush.bf16.msra.mxu3 %v1557_v10  ;;  %v2010_v41 = vld [vmem:[#allocation5 + $0x438] sm:$0xf0]  ;;  %v244_v43 = vunpack.c.l.b16 %v81_v38  ;;  %v2122_v48 = vld [vmem:[#allocation5 + $0x4] sm:$0xf]  ;;  %v2162_v51 = vld [vmem:[#allocation5 + $0x13c] sm:$0xf0] }
  0x2e   :  { %1002 = vmatpush.bf16.msra.mxu2 %v1913_v7  ;;  %v1482_v49 = vld [vmem:[#allocation5 + $0x18] sm:$0xf0]  ;;  %v1848_v52 = vld [vmem:[#allocation5 + $0x2d8] sm:$0xf]  ;;  %v2216_v53 = vld [vmem:[#allocation5 + $0x2ec] sm:$0xf0]  ;;  %v2499_v54 = vpack.c.b16 %v242_v44, %v242_v44  ;;  %v2013_v55 = vor.u32 %v2254_v40, %v2010_v41  ;;  %v2503_v59 = vpack.c.b16 %v243_v45, %v243_v45  ;;  %v1633_v63 = vor.u32 %v2162_v51, %v1632_v47 }
  0x2f   :  { %977 = vmatpush.bf16.msra.mxu0 %v1505_v11  ;;  %v2200_v56 = vld [vmem:[#allocation5 + $0x274] sm:$0xf]  ;;  %v1794_v57 = vld [vmem:[#allocation5 + $0x288] sm:$0xf0]  ;;  %v2501_v58 = vpack.c.b16 %v244_v43, %v244_v43  ;;  %v1485_v62 = vor.u32 %v2122_v48, %v1482_v49  ;;  %v1608_v0 = vld [vmem:[#allocation5 + $0xf8] sm:$0xf]  ;;  %v1849_v1 = vor.u32 %v2216_v53, %v1848_v52 }
  0x30   :  { %990 = vmatpush.bf16.msra.mxu1 %v1697_v15  ;;  %v2248_v60 = vld [vmem:[#allocation5 + $0x3f4] sm:$0xf]  ;;  %v1986_v61 = vld [vmem:[#allocation5 + $0x408] sm:$0xf0]  ;;  %v1797_v2 = vor.u32 %v2200_v56, %v1794_v57  ;;  %v2156_v3 = vld [vmem:[#allocation5 + $0x10c] sm:$0xf0] }
  0x31   :  { %1015 = vmatpush.bf16.msra.mxu3 %v1533_v26  ;;  %v1824_v4 = vld [vmem:[#allocation5 + $0x2a8] sm:$0xf]  ;;  %v2210_v5 = vld [vmem:[#allocation5 + $0x2bc] sm:$0xf0]  ;;  %v1989_v6 = vor.u32 %v2248_v60, %v1986_v61  ;;  %v2194_v7 = vld [vmem:[#allocation5 + $0x244] sm:$0xf]  ;;  %v1609_v11 = vor.u32 %v2156_v3, %v1608_v0 }
  0x32   :  { %1003 = vmatpush.bf16.msra.mxu2 %v1889_v22  ;;  %v1770_v8 = vld [vmem:[#allocation5 + $0x258] sm:$0xf0]  ;;  %v2242_v9 = vld [vmem:[#allocation5 + $0x3c4] sm:$0xf]  ;;  %v1584_v12 = vld [vmem:[#allocation5 + $0xc8] sm:$0xf]  ;;  %v1825_v13 = vor.u32 %v2210_v5, %v1824_v4 }
  0x33   :  { %978 = vmatpush.bf16.msra.mxu0 %v1481_v27  ;;  %v1962_v10 = vld [vmem:[#allocation5 + $0x3d8] sm:$0xf0]  ;;  %v1773_v14 = vor.u32 %v2194_v7, %v1770_v8  ;;  %v2150_v15 = vld [vmem:[#allocation5 + $0xdc] sm:$0xf0]  ;;  %v1800_v16 = vld [vmem:[#allocation5 + $0x278] sm:$0xf] }
  0x34   :  { %991 = vmatpush.bf16.msra.mxu1 %v1673_v30  ;;  %v2204_v17 = vld [vmem:[#allocation5 + $0x28c] sm:$0xf0]  ;;  %v1965_v18 = vor.u32 %v2242_v9, %v1962_v10  ;;  %v2188_v19 = vld [vmem:[#allocation5 + $0x214] sm:$0xf]  ;;  %v1746_v20 = vld [vmem:[#allocation5 + $0x228] sm:$0xf0]  ;;  %v1585_v23 = vor.u32 %v2150_v15, %v1584_v12 }
  0x35   :  { %1016 = vmatpush.bf16.msra.mxu3 %v1509_v42  ;;  %v2236_v21 = vld [vmem:[#allocation5 + $0x394] sm:$0xf]  ;;  %v1938_v22 = vld [vmem:[#allocation5 + $0x3a8] sm:$0xf0]  ;;  %v1560_v24 = vld [vmem:[#allocation5 + $0x98] sm:$0xf]  ;;  %v1801_v25 = vor.u32 %v2204_v17, %v1800_v16  ;;  %v1749_v26 = vor.u32 %v2188_v19, %v1746_v20 }
  0x36   :  { %1004 = vmatpush.bf16.msra.mxu2 %v1865_v36  ;;  %979 = vmatmul.bf16.vlgmr.msra.gmra.mxu0 %v2499_v54  ;;  %v2144_v27 = vld [vmem:[#allocation5 + $0xac] sm:$0xf0]  ;;  %v1776_v28 = vld [vmem:[#allocation5 + $0x248] sm:$0xf]  ;;  %v2198_v29 = vld [vmem:[#allocation5 + $0x25c] sm:$0xf0]  ;;  %v1941_v30 = vor.u32 %v2236_v21, %v1938_v22 }
  0x37   :  { %1023 = vmatpush.bf16.msrb.mxu0 %v1845_v31  ;;  %992 = vmatmul.bf16.vlgmr.msra.gmra.mxu1 %v2503_v59  ;;  %v2182_v31 = vld [vmem:[#allocation5 + $0x1e4] sm:$0xf]  ;;  %v1722_v32 = vld [vmem:[#allocation5 + $0x1f8] sm:$0xf0]  ;;  %v1536_v36 = vld [vmem:[#allocation5 + $0x68] sm:$0xf]  ;;  %v1777_v37 = vor.u32 %v2198_v29, %v1776_v28 }
  0x38   :  { %1036 = vmatpush.bf16.msrb.mxu1 %v2037_v35  ;;  %v2230_v33 = vld [vmem:[#allocation5 + $0x364] sm:$0xf]  ;;  %v1914_v34 = vld [vmem:[#allocation5 + $0x378] sm:$0xf0]  ;;  %v1561_v35 = vor.u32 %v2144_v27, %v1560_v24  ;;  %v1725_v38 = vor.u32 %v2182_v31, %v1722_v32  ;;  %v2138_v39 = vld [vmem:[#allocation5 + $0x7c] sm:$0xf0] }
  0x39   :  { %1005 = vmatmul.bf16.vlgmr.msra.gmra.mxu2 %v2501_v58  ;;  %1017 = vmatpush.bf16.msra.mxu3 %v1485_v62  ;;  %v1752_v40 = vld [vmem:[#allocation5 + $0x218] sm:$0xf]  ;;  %v2192_v41 = vld [vmem:[#allocation5 + $0x22c] sm:$0xf0]  ;;  %v1917_v42 = vor.u32 %v2230_v33, %v1914_v34  ;;  %v2176_v43 = vld [vmem:[#allocation5 + $0x1b4] sm:$0xf]  ;;  %v1537_v47 = vor.u32 %v2138_v39, %v1536_v36 }
  0x3a   :  { %1049 = vmatpush.bf16.msrb.mxu2 %v1657_v46  ;;  %v1698_v44 = vld [vmem:[#allocation5 + $0x1c8] sm:$0xf0]  ;;  %v2224_v45 = vld [vmem:[#allocation5 + $0x334] sm:$0xf]  ;;  %v1512_v48 = vld [vmem:[#allocation5 + $0x38] sm:$0xf]  ;;  %v1753_v49 = vor.u32 %v2192_v41, %v1752_v40 }
  0x3b   :  { %1024 = vmatpush.bf16.msrb.mxu0 %v1821_v50  ;;  %v1890_v46 = vld [vmem:[#allocation5 + $0x348] sm:$0xf0]  ;;  %v1701_v50 = vor.u32 %v2176_v43, %v1698_v44  ;;  %v2132_v51 = vld [vmem:[#allocation5 + $0x4c] sm:$0xf0]  ;;  %v1728_v52 = vld [vmem:[#allocation5 + $0x1e8] sm:$0xf] }
  0x3c   :  { %1037 = vmatpush.bf16.msrb.mxu1 %v2013_v55  ;;  %1018 = vmatmul.bf16.vlgmr.msra.gmra.mxu3 %v2499_v54  ;;  %v2186_v53 = vld [vmem:[#allocation5 + $0x1fc] sm:$0xf0]  ;;  %v1893_v55 = vor.u32 %v2224_v45, %v1890_v46  ;;  %v2170_v56 = vld [vmem:[#allocation5 + $0x184] sm:$0xf]  ;;  %v1674_v57 = vld [vmem:[#allocation5 + $0x198] sm:$0xf0]  ;;  %v1513_v0 = vor.u32 %v2132_v51, %v1512_v48 }
  0x3d   :  { %1062 = vmatpush.bf16.msrb.mxu3 %v1849_v1  ;;  %v2218_v60 = vld [vmem:[#allocation5 + $0x304] sm:$0xf]  ;;  %v1866_v61 = vld [vmem:[#allocation5 + $0x318] sm:$0xf0]  ;;  %v2040_v62 = vld [vmem:[#allocation5 + $0x458] sm:$0xf]  ;;  %v1729_v4 = vor.u32 %v2186_v53, %v1728_v52  ;;  %v1677_v5 = vor.u32 %v2170_v56, %v1674_v57 }
  0x3e   :  { %1050 = vmatpush.bf16.msrb.mxu2 %v1633_v63  ;;  %v2264_v63 = vld [vmem:[#allocation5 + $0x46c] sm:$0xf0]  ;;  %v2165_v1 = vld [vmem:[#allocation5 + $0x15c] sm:$0xf]  ;;  %v1488_v3 = vld [vmem:[#allocation5 + $0x8] sm:$0xf]  ;;  %v1869_v9 = vor.u32 %v2218_v60, %v1866_v61 }
  0x3f   :  { %1025 = vmatpush.bf16.msrb.mxu0 %v1797_v2  ;;  %v1658_v2 = vld [vmem:[#allocation5 + $0x170] sm:$0xf0]  ;;  %v1704_v7 = vld [vmem:[#allocation5 + $0x1b8] sm:$0xf]  ;;  %v2180_v8 = vld [vmem:[#allocation5 + $0x1cc] sm:$0xf0]  ;;  %v2041_v10 = vor.u32 %v2264_v63, %v2040_v62 }
  0x40   :  { %1038 = vmatpush.bf16.msrb.mxu1 %v1989_v6  ;;  %v2126_v6 = vld [vmem:[#allocation5 + $0x1c] sm:$0xf0]  ;;  %v1850_v12 = vld [vmem:[#allocation5 + $0x2f0] sm:$0xf0]  ;;  %v2159_v17 = vld [vmem:[#allocation5 + $0x12c] sm:$0xf]  ;;  %v1705_v19 = vor.u32 %v2180_v8, %v1704_v7 }
  0x41   :  { %1063 = vmatpush.bf16.msrb.mxu3 %v1825_v13  ;;  %v1661_v13 = vor.u32 %v2165_v1, %v1658_v2  ;;  %v2258_v15 = vld [vmem:[#allocation5 + $0x43c] sm:$0xf0]  ;;  %v1489_v16 = vor.u32 %v2126_v6, %v1488_v3  ;;  %v2207_v21 = vld [vmem:[#allocation5 + $0x2ac] sm:$0xf]  ;;  %v1680_v22 = vld [vmem:[#allocation5 + $0x188] sm:$0xf] }
  0x42   :  { %1051 = vmatpush.bf16.msrb.mxu2 %v1609_v11  ;;  %v2213_v11 = vld [vmem:[#allocation5 + $0x2dc] sm:$0xf]  ;;  %v2042_v27 = vld [vmem:[#allocation5 + $0x470] sm:$0xf0]  ;;  %v1992_v29 = vld [vmem:[#allocation5 + $0x3f8] sm:$0xf] }
  0x43   :  { %1026 = vmatpush.bf16.msrb.mxu0 %v1773_v14  ;;  %v2016_v14 = vld [vmem:[#allocation5 + $0x428] sm:$0xf]  ;;  %v1853_v20 = vor.u32 %v2213_v11, %v1850_v12  ;;  %v2153_v31 = vld [vmem:[#allocation5 + $0xfc] sm:$0xf]  ;;  %v1610_v32 = vld [vmem:[#allocation5 + $0x110] sm:$0xf0] }
  0x44   :  { %1039 = vmatpush.bf16.msrb.mxu1 %v1965_v18  ;;  %v1634_v18 = vld [vmem:[#allocation5 + $0x140] sm:$0xf0]  ;;  %v2017_v24 = vor.u32 %v2258_v15, %v2016_v14  ;;  %v2255_v39 = vld [vmem:[#allocation5 + $0x42c] sm:$0xf]  ;;  %v1613_v41 = vor.u32 %v2153_v31, %v1610_v32  ;;  %v2246_v43 = vld [vmem:[#allocation5 + $0x3dc] sm:$0xf0] }
  0x45   :  { %1064 = vmatpush.bf16.msrb.mxu3 %v1801_v25  ;;  %v1826_v25 = vld [vmem:[#allocation5 + $0x2c0] sm:$0xf0]  ;;  %v1637_v28 = vor.u32 %v2159_v17, %v1634_v18  ;;  %v2147_v44 = vld [vmem:[#allocation5 + $0xcc] sm:$0xf]  ;;  %v2249_v51 = vld [vmem:[#allocation5 + $0x3fc] sm:$0xf] }
  0x46   :  { %1052 = vmatpush.bf16.msrb.mxu2 %v1585_v23  ;;  %v2174_v23 = vld [vmem:[#allocation5 + $0x19c] sm:$0xf0]  ;;  %v1829_v34 = vor.u32 %v2207_v21, %v1826_v25  ;;  %v2018_v40 = vld [vmem:[#allocation5 + $0x440] sm:$0xf0]  ;;  %v1994_v52 = vld [vmem:[#allocation5 + $0x410] sm:$0xf0] }
  0x47   :  { %1027 = vmatpush.bf16.msrb.mxu0 %v1749_v26  ;;  %v2261_v26 = vld [vmem:[#allocation5 + $0x45c] sm:$0xf]  ;;  %v1681_v33 = vor.u32 %v2174_v23, %v1680_v22  ;;  %v1586_v45 = vld [vmem:[#allocation5 + $0xe0] sm:$0xf0]  ;;  %v2021_v48 = vor.u32 %v2255_v39, %v2018_v40  ;;  %v2240_v56 = vld [vmem:[#allocation5 + $0x3ac] sm:$0xf0]  ;;  %v1997_v63 = vor.u32 %v2249_v51, %v1994_v52 }
  0x48   :  { %1040 = vmatpush.bf16.msrb.mxu1 %v1941_v30  ;;  %v2252_v30 = vld [vmem:[#allocation5 + $0x40c] sm:$0xf0]  ;;  %v2045_v36 = vor.u32 %v2261_v26, %v2042_v27  ;;  %v1589_v53 = vor.u32 %v2147_v44, %v1586_v45  ;;  %v2141_v57 = vld [vmem:[#allocation5 + $0x9c] sm:$0xf]  ;;  %v1562_v60 = vld [vmem:[#allocation5 + $0xb0] sm:$0xf0] }
  0x49   :  { %1065 = vmatpush.bf16.msrb.mxu3 %v1777_v37  ;;  %v1993_v37 = vor.u32 %v2252_v30, %v1992_v29  ;;  %v2189_v62 = vld [vmem:[#allocation5 + $0x21c] sm:$0xf]  ;;  %v1754_v1 = vld [vmem:[#allocation5 + $0x230] sm:$0xf0]  ;;  %v2243_v2 = vld [vmem:[#allocation5 + $0x3cc] sm:$0xf] }
  0x4a   :  { %1053 = vmatpush.bf16.msrb.mxu2 %v1561_v35  ;;  %v2201_v35 = vld [vmem:[#allocation5 + $0x27c] sm:$0xf]  ;;  %v1970_v3 = vld [vmem:[#allocation5 + $0x3e0] sm:$0xf0]  ;;  %v2234_v6 = vld [vmem:[#allocation5 + $0x37c] sm:$0xf0] }
  0x4b   :  { %1028 = vmatpush.bf16.msrb.mxu0 %v1725_v38  ;;  %v1802_v38 = vld [vmem:[#allocation5 + $0x290] sm:$0xf0]  ;;  %v2135_v7 = vld [vmem:[#allocation5 + $0x6c] sm:$0xf]  ;;  %v1538_v8 = vld [vmem:[#allocation5 + $0x80] sm:$0xf0]  ;;  %v1973_v11 = vor.u32 %v2243_v2, %v1970_v3 }
  0x4c   :  { %1041 = vmatpush.bf16.msrb.mxu1 %v1917_v42  ;;  %v1968_v42 = vld [vmem:[#allocation5 + $0x3c8] sm:$0xf]  ;;  %v1805_v46 = vor.u32 %v2201_v35, %v1802_v38  ;;  %v2237_v14 = vld [vmem:[#allocation5 + $0x39c] sm:$0xf]  ;;  %v1946_v15 = vld [vmem:[#allocation5 + $0x3b0] sm:$0xf0] }
  0x4d   :  { %1066 = vmatpush.bf16.msrb.mxu3 %v1753_v49  ;;  %v1969_v49 = vor.u32 %v2246_v43, %v1968_v42  ;;  %v1896_v17 = vld [vmem:[#allocation5 + $0x338] sm:$0xf]  ;;  %v2228_v18 = vld [vmem:[#allocation5 + $0x34c] sm:$0xf0]  ;;  %v2177_v22 = vld [vmem:[#allocation5 + $0x1bc] sm:$0xf]  ;;  %v1949_v23 = vor.u32 %v2237_v14, %v1946_v15 }
  0x4e   :  { %1054 = vmatpush.bf16.msrb.mxu2 %v1537_v47  ;;  %v2195_v47 = vld [vmem:[#allocation5 + $0x24c] sm:$0xf]  ;;  %v1706_v25 = vld [vmem:[#allocation5 + $0x1d0] sm:$0xf0]  ;;  %v1922_v27 = vld [vmem:[#allocation5 + $0x380] sm:$0xf0] }
  0x4f   :  { %1029 = vmatpush.bf16.msrb.mxu0 %v1701_v50  ;;  %v1778_v50 = vld [vmem:[#allocation5 + $0x260] sm:$0xf0]  ;;  %v2231_v26 = vld [vmem:[#allocation5 + $0x36c] sm:$0xf]  ;;  %v1872_v29 = vld [vmem:[#allocation5 + $0x308] sm:$0xf]  ;;  %v1709_v35 = vor.u32 %v2177_v22, %v1706_v25 }
  0x50   :  { %1042 = vmatpush.bf16.msrb.mxu1 %v1893_v55  ;;  %v1944_v55 = vld [vmem:[#allocation5 + $0x398] sm:$0xf]  ;;  %v1781_v61 = vor.u32 %v2195_v47, %v1778_v50  ;;  %v2222_v30 = vld [vmem:[#allocation5 + $0x31c] sm:$0xf0]  ;;  %v2123_v31 = vld [vmem:[#allocation5 + $0xc] sm:$0xf]  ;;  %v1925_v38 = vor.u32 %v2231_v26, %v1922_v27 }
  0x51   :  { %1067 = vmatpush.bf16.msrb.mxu3 %v1729_v4  ;;  %v1565_v4 = vor.u32 %v2141_v57, %v1562_v60  ;;  %v1490_v32 = vld [vmem:[#allocation5 + $0x20] sm:$0xf0]  ;;  %v1873_v39 = vor.u32 %v2222_v30, %v1872_v29  ;;  %v2171_v40 = vld [vmem:[#allocation5 + $0x18c] sm:$0xf]  ;;  %v2048_v42 = vld [vmem:[#allocation5 + $0x460] sm:$0xf] }
  0x52   :  { %1055 = vmatpush.bf16.msrb.mxu2 %v1513_v0  ;;  %v1945_v0 = vor.u32 %v2240_v56, %v1944_v55  ;;  %v1493_v43 = vor.u32 %v2123_v31, %v1490_v32  ;;  %v2265_v45 = vld [vmem:[#allocation5 + $0x474] sm:$0xf0]  ;;  %v1898_v47 = vld [vmem:[#allocation5 + $0x350] sm:$0xf0]  ;;  %v2163_v50 = vld [vmem:[#allocation5 + $0x144] sm:$0xf0] }
  0x53   :  { %1030 = vmatpush.bf16.msrb.mxu0 %v1677_v5  ;;  %v1920_v5 = vld [vmem:[#allocation5 + $0x368] sm:$0xf]  ;;  %v1832_v52 = vld [vmem:[#allocation5 + $0x2b0] sm:$0xf]  ;;  %v2049_v55 = vor.u32 %v2265_v45, %v2048_v42  ;;  %v1616_v57 = vld [vmem:[#allocation5 + $0x100] sm:$0xf] }
  0x54   :  { %1043 = vmatpush.bf16.msrb.mxu1 %v1869_v9  ;;  %v1757_v9 = vor.u32 %v2189_v62, %v1754_v1  ;;  %v1921_v12 = vor.u32 %v2234_v6, %v1920_v5  ;;  %v2024_v60 = vld [vmem:[#allocation5 + $0x430] sm:$0xf]  ;;  %v2259_v62 = vld [vmem:[#allocation5 + $0x444] sm:$0xf0]  ;;  %v2157_v2 = vld [vmem:[#allocation5 + $0x114] sm:$0xf0] }
  0x55   :  { %1068 = vmatpush.bf16.msrb.mxu3 %v1705_v19  ;;  %v2129_v19 = vld [vmem:[#allocation5 + $0x3c] sm:$0xf]  ;;  %v2166_v3 = vld [vmem:[#allocation5 + $0x164] sm:$0xf]  ;;  %v1808_v5 = vld [vmem:[#allocation5 + $0x280] sm:$0xf] }
  0x56   :  { %1056 = vmatpush.bf16.msrb.mxu2 %v1489_v16  ;;  %1031 = vmatmul.bf16.vlgmr.msrb.gmra.mxu0 %v2503_v59  ;;  %v1541_v16 = vor.u32 %v2135_v7, %v1538_v8  ;;  %v2205_v6 = vld [vmem:[#allocation5 + $0x294] sm:$0xf0]  ;;  %v2025_v7 = vor.u32 %v2259_v62, %v2024_v60  ;;  %v2151_v15 = vld [vmem:[#allocation5 + $0xe4] sm:$0xf0]  ;;  %v1568_v22 = vld [vmem:[#allocation5 + $0xa0] sm:$0xf] }
  0x57   :  { %1075 = vmatpush.bf16.msra.mxu0 %v2041_v10  ;;  %1044 = vmatmul.bf16.vlgmr.msrb.gmra.mxu1 %v2501_v58  ;;  %v2183_v10 = vld [vmem:[#allocation5 + $0x1ec] sm:$0xf]  ;;  %v1809_v14 = vor.u32 %v2205_v6, %v1808_v5  ;;  %v2145_v27 = vld [vmem:[#allocation5 + $0xb4] sm:$0xf0]  ;;  %v1618_v29 = vld [vmem:[#allocation5 + $0x118] sm:$0xf0] }
  0x58   :  { %1088 = vmatpush.bf16.msra.mxu1 %v1661_v13  ;;  %v1730_v13 = vld [vmem:[#allocation5 + $0x200] sm:$0xf0]  ;;  %v1760_v30 = vld [vmem:[#allocation5 + $0x220] sm:$0xf]  ;;  %v2193_v31 = vld [vmem:[#allocation5 + $0x234] sm:$0xf0] }
  0x59   :  { %1057 = vmatmul.bf16.vlgmr.msrb.gmra.mxu2 %v2499_v54  ;;  %1069 = vmatpush.bf16.msrb.mxu3 %v1681_v33  ;;  %v1733_v21 = vor.u32 %v2183_v10, %v1730_v13  ;;  %v1664_v33 = vld [vmem:[#allocation5 + $0x160] sm:$0xf]  ;;  %v1592_v10 = vld [vmem:[#allocation5 + $0xd0] sm:$0xf]  ;;  %v2127_v62 = vld [vmem:[#allocation5 + $0x24] sm:$0xf0] }
  0x5a   :  { %1101 = vmatpush.bf16.msra.mxu2 %v1853_v20  ;;  %v1514_v20 = vld [vmem:[#allocation5 + $0x50] sm:$0xf0]  ;;  %v1736_v42 = vld [vmem:[#allocation5 + $0x1f0] sm:$0xf]  ;;  %v1546_v5 = vld [vmem:[#allocation5 + $0x88] sm:$0xf0] }
  0x5b   :  { %1076 = vmatpush.bf16.msra.mxu0 %v2017_v24  ;;  %v1897_v24 = vor.u32 %v2228_v18, %v1896_v17  ;;  %v1642_v17 = vld [vmem:[#allocation5 + $0x148] sm:$0xf0]  ;;  %v1784_v18 = vld [vmem:[#allocation5 + $0x250] sm:$0xf]  ;;  %v2175_v6 = vld [vmem:[#allocation5 + $0x1a4] sm:$0xf0] }
  0x5c   :  { %1089 = vmatpush.bf16.msra.mxu1 %v1637_v28  ;;  %1070 = vmatmul.bf16.vlgmr.msrb.gmra.mxu3 %v2503_v59  ;;  %v1517_v28 = vor.u32 %v2129_v19, %v1514_v20  ;;  %v2199_v19 = vld [vmem:[#allocation5 + $0x264] sm:$0xf0]  ;;  %v1496_v60 = vld [vmem:[#allocation5 + $0x10] sm:$0xf]  ;;  %s1464_s16 = sshll.u32 %s2456_s15, 4  ;;  %s1466_s19 = sshll.u32 %s2542_s5, 4  ;;  %s1465_s16 = int_to_ptr.vmem [resolvable:$true] %s1464_s16  ;;  %s1467_s19 = int_to_ptr.hbm [resolvable:$true] %s1466_s19 }
  0x5d   :  { %1114 = vmatpush.bf16.msra.mxu3 %v2045_v36  ;;  %v1856_v36 = vld [vmem:[#allocation5 + $0x2e0] sm:$0xf]  ;;  %v1785_v26 = vor.u32 %v2199_v19, %v1784_v18  ;;  %v2130_v18 = vld [vmem:[#allocation5 + $0x44] sm:$0xf]  ;;  %v1522_v19 = vld [vmem:[#allocation5 + $0x58] sm:$0xf0] }
  0x5e   :  { %1102 = vmatpush.bf16.msra.mxu2 %v1829_v34  ;;  %v2169_v34 = vld [vmem:[#allocation5 + $0x174] sm:$0xf0] }
  0x5f   :  { %1077 = vmatpush.bf16.msra.mxu0 %v1993_v37  ;;  %v2217_v37 = vld [vmem:[#allocation5 + $0x2f4] sm:$0xf0]  ;;  %v1665_v44 = vor.u32 %v2169_v34, %v1664_v33  ;;  %v1569_v33 = vor.u32 %v2145_v27, %v1568_v22  ;;  %v1544_v34 = vld [vmem:[#allocation5 + $0x70] sm:$0xf]  ;;  %v1834_v22 = vld [vmem:[#allocation5 + $0x2c8] sm:$0xf0] }
  0x60   :  { %1090 = vmatpush.bf16.msra.mxu1 %v1613_v41  ;;  %v1682_v41 = vld [vmem:[#allocation5 + $0x1a0] sm:$0xf0] }
  0x61   :  { %1115 = vmatpush.bf16.msra.mxu3 %v2021_v48  ;;  %v1857_v48 = vor.u32 %v2217_v37, %v1856_v36  ;;  %v1685_v51 = vor.u32 %v2171_v40, %v1682_v41  ;;  %v2241_v36 = vld [vmem:[#allocation5 + $0x3b4] sm:$0xf0]  ;;  %v2148_v40 = vld [vmem:[#allocation5 + $0xd4] sm:$0xf]  ;;  %v1594_v41 = vld [vmem:[#allocation5 + $0xe8] sm:$0xf0] }
  0x62   :  { %1103 = vmatpush.bf16.msra.mxu2 %v1805_v46  ;;  %v2225_v46 = vld [vmem:[#allocation5 + $0x33c] sm:$0xf] }
  0x63   :  { %1078 = vmatpush.bf16.msra.mxu0 %v1969_v49  ;;  %v1640_v49 = vld [vmem:[#allocation5 + $0x130] sm:$0xf]  ;;  %v1901_v56 = vor.u32 %v2225_v46, %v1898_v47  ;;  %v1520_v46 = vld [vmem:[#allocation5 + $0x40] sm:$0xf] }
  0x64   :  { %1091 = vmatpush.bf16.msra.mxu1 %v1589_v53  ;;  %v2211_v53 = vld [vmem:[#allocation5 + $0x2c4] sm:$0xf0]  ;;  %v1928_v47 = vld [vmem:[#allocation5 + $0x370] sm:$0xf] }
  0x65   :  { %1116 = vmatpush.bf16.msra.mxu3 %v1997_v63  ;;  %v2219_v63 = vld [vmem:[#allocation5 + $0x30c] sm:$0xf]  ;;  %v1833_v1 = vor.u32 %v2211_v53, %v1832_v52  ;;  %v2142_v52 = vld [vmem:[#allocation5 + $0xa4] sm:$0xf]  ;;  %v1570_v53 = vld [vmem:[#allocation5 + $0xb8] sm:$0xf0] }
  0x66   :  { %1104 = vmatpush.bf16.msra.mxu2 %v1781_v61  ;;  %v1641_v61 = vor.u32 %v2163_v50, %v1640_v49  ;;  %v1597_v49 = vor.u32 %v2148_v40, %v1594_v41  ;;  %v2244_v40 = vld [vmem:[#allocation5 + $0x3d4] sm:$0xf]  ;;  %v1978_v41 = vld [vmem:[#allocation5 + $0x3e8] sm:$0xf0] }
  0x67   :  { %1079 = vmatpush.bf16.msra.mxu0 %v1945_v0  ;;  %v1874_v0 = vld [vmem:[#allocation5 + $0x320] sm:$0xf0] }
  0x68   :  { %1092 = vmatpush.bf16.msra.mxu1 %v1565_v4  ;;  %v1666_v4 = vld [vmem:[#allocation5 + $0x178] sm:$0xf0]  ;;  %v1877_v8 = vor.u32 %v2219_v63, %v1874_v0  ;;  %v1904_v63 = vld [vmem:[#allocation5 + $0x340] sm:$0xf]  ;;  %v2229_v0 = vld [vmem:[#allocation5 + $0x354] sm:$0xf0] }
  0x69   :  { %1117 = vmatpush.bf16.msra.mxu3 %v1973_v11  ;;  %v2000_v11 = vld [vmem:[#allocation5 + $0x400] sm:$0xf]  ;;  %v1669_v13 = vor.u32 %v2166_v3, %v1666_v4  ;;  %v1688_v3 = vld [vmem:[#allocation5 + $0x190] sm:$0xf]  ;;  %v2136_v4 = vld [vmem:[#allocation5 + $0x74] sm:$0xf] }
  0x6a   :  { %1105 = vmatpush.bf16.msra.mxu2 %v1757_v9  ;;  %v1617_v9 = vor.u32 %v2157_v2, %v1616_v57 }
  0x6b   :  { %1080 = vmatpush.bf16.msra.mxu0 %v1921_v12  ;;  %v2253_v12 = vld [vmem:[#allocation5 + $0x414] sm:$0xf0] }
  0x6c   :  { %1093 = vmatpush.bf16.msra.mxu1 %v1541_v16  ;;  %v2160_v16 = vld [vmem:[#allocation5 + $0x134] sm:$0xf]  ;;  %v2001_v20 = vor.u32 %v2253_v12, %v2000_v11  ;;  %v2050_v11 = vld [vmem:[#allocation5 + $0x478] sm:$0xf0]  ;;  %v1497_v12 = vor.u32 %v2127_v62, %v1496_v60 }
  0x6d   :  { %1118 = vmatpush.bf16.msra.mxu3 %v1949_v23  ;;  %v1976_v23 = vld [vmem:[#allocation5 + $0x3d0] sm:$0xf]  ;;  %v1645_v25 = vor.u32 %v2160_v16, %v1642_v17  ;;  %v1689_v16 = vor.u32 %v2175_v6, %v1688_v3  ;;  %v1714_v60 = vld [vmem:[#allocation5 + $0x1d8] sm:$0xf0]  ;;  %v1882_v3 = vld [vmem:[#allocation5 + $0x328] sm:$0xf0] }
  0x6e   :  { %1106 = vmatpush.bf16.msra.mxu2 %v1733_v21  ;;  %v1593_v21 = vor.u32 %v2151_v15, %v1592_v10  ;;  %v2262_v10 = vld [vmem:[#allocation5 + $0x464] sm:$0xf]  ;;  %v1549_v15 = vor.u32 %v2136_v4, %v1546_v5  ;;  %v1906_v62 = vld [vmem:[#allocation5 + $0x358] sm:$0xf0] }
  0x6f   :  { %1081 = vmatpush.bf16.msra.mxu0 %v1897_v24  ;;  %v2247_v24 = vld [vmem:[#allocation5 + $0x3e4] sm:$0xf0] }
  0x70   :  { %1094 = vmatpush.bf16.msra.mxu1 %v1517_v28  ;;  %v2154_v28 = vld [vmem:[#allocation5 + $0x104] sm:$0xf]  ;;  %v1977_v32 = vor.u32 %v2247_v24, %v1976_v23  ;;  %v2256_v24 = vld [vmem:[#allocation5 + $0x434] sm:$0xf] }
  0x71   :  { %1119 = vmatpush.bf16.msra.mxu3 %v1925_v38  ;;  %v1621_v37 = vor.u32 %v2154_v28, %v1618_v29  ;;  %v1761_v38 = vor.u32 %v2193_v31, %v1760_v30  ;;  %v2124_v28 = vld [vmem:[#allocation5 + $0x14] sm:$0xf]  ;;  %v1498_v29 = vld [vmem:[#allocation5 + $0x28] sm:$0xf0]  ;;  %v2202_v31 = vld [vmem:[#allocation5 + $0x284] sm:$0xf] }
  0x72   :  { %1107 = vmatpush.bf16.msra.mxu2 %v1709_v35  ;;  %v1952_v35 = vld [vmem:[#allocation5 + $0x3a0] sm:$0xf] }
  0x73   :  { %1082 = vmatpush.bf16.msra.mxu0 %v1873_v39  ;;  %v2139_v39 = vld [vmem:[#allocation5 + $0x84] sm:$0xf0] }
  0x74   :  { %1095 = vmatpush.bf16.msra.mxu1 %v1493_v43  ;;  %v2187_v43 = vld [vmem:[#allocation5 + $0x204] sm:$0xf0]  ;;  %v1545_v45 = vor.u32 %v2139_v39, %v1544_v34  ;;  %v2002_v34 = vld [vmem:[#allocation5 + $0x418] sm:$0xf0]  ;;  %v1786_v39 = vld [vmem:[#allocation5 + $0x268] sm:$0xf0] }
  0x75   :  { %1120 = vmatpush.bf16.msra.mxu3 %v1901_v56  ;;  %v1737_v50 = vor.u32 %v2187_v43, %v1736_v42  ;;  %v2181_v56 = vld [vmem:[#allocation5 + $0x1d4] sm:$0xf0]  ;;  %v1981_v43 = vor.u32 %v2244_v40, %v1978_v41 }
  0x76   :  { %1083 = vmatmul.bf16.vlgmr.msra.gmra.mxu0 %v2501_v58  ;;  %1108 = vmatpush.bf16.msra.mxu2 %v1685_v51  ;;  %v2133_v51 = vld [vmem:[#allocation5 + $0x54] sm:$0xf0] }
  0x77   :  { %1127 = vmatpush.bf16.msrb.mxu0 %v1665_v44  ;;  %1096 = vmatmul.bf16.vlgmr.msra.gmra.mxu1 %v2499_v54  ;;  %v1953_v44 = vor.u32 %v2241_v36, %v1952_v35  ;;  %v1501_v35 = vor.u32 %v2124_v28, %v1498_v29 }
  0x78   :  { %1140 = vmatpush.bf16.msrb.mxu1 %v1857_v48  ;;  %v2235_v48 = vld [vmem:[#allocation5 + $0x384] sm:$0xf0] }
  0x79   :  { %1109 = vmatmul.bf16.vlgmr.msra.gmra.mxu2 %v2503_v59  ;;  %1121 = vmatpush.bf16.msra.mxu3 %v1877_v8  ;;  %v1929_v57 = vor.u32 %v2235_v48, %v1928_v47  ;;  %v1858_v8 = vld [vmem:[#allocation5 + $0x2f8] sm:$0xf0] }
  0x7a   :  { %1153 = vmatpush.bf16.msrb.mxu2 %v2049_v55  ;;  %v1712_v55 = vld [vmem:[#allocation5 + $0x1c0] sm:$0xf]  ;;  %v1954_v47 = vld [vmem:[#allocation5 + $0x3b8] sm:$0xf0] }
  0x7b   :  { %1128 = vmatpush.bf16.msrb.mxu0 %v1641_v61  ;;  %v1521_v61 = vor.u32 %v2133_v51, %v1520_v46  ;;  %v1713_v2 = vor.u32 %v2181_v56, %v1712_v55  ;;  %v2238_v46 = vld [vmem:[#allocation5 + $0x3a4] sm:$0xf]  ;;  %v1738_v51 = vld [vmem:[#allocation5 + $0x208] sm:$0xf0] }
  0x7c   :  { %1141 = vmatpush.bf16.msrb.mxu1 %v1833_v1  ;;  %1122 = vmatmul.bf16.vlgmr.msra.gmra.mxu3 %v2501_v58  ;;  %v1573_v1 = vor.u32 %v2142_v52, %v1570_v53  ;;  %v2232_v52 = vld [vmem:[#allocation5 + $0x374] sm:$0xf]  ;;  %v1930_v53 = vld [vmem:[#allocation5 + $0x388] sm:$0xf0] }
  0x7d   :  { %1166 = vmatpush.bf16.msrb.mxu3 %v1669_v13  ;;  %v1880_v13 = vld [vmem:[#allocation5 + $0x310] sm:$0xf]  ;;  %v1933_v56 = vor.u32 %v2232_v52, %v1930_v53 }
  0x7e   :  { %1154 = vmatpush.bf16.msrb.mxu2 %v2025_v7  ;;  %v2214_v7 = vld [vmem:[#allocation5 + $0x2e4] sm:$0xf] }
  0x7f   :  { %1129 = vmatpush.bf16.msrb.mxu0 %v1617_v9  ;;  %v1905_v9 = vor.u32 %v2229_v0, %v1904_v63  ;;  %v1861_v17 = vor.u32 %v2214_v7, %v1858_v8  ;;  %v2172_v0 = vld [vmem:[#allocation5 + $0x194] sm:$0xf] }
  0x80   :  { %1142 = vmatpush.bf16.msrb.mxu1 %v1809_v14  ;;  %v2223_v14 = vld [vmem:[#allocation5 + $0x324] sm:$0xf0] }
  0x81   :  { %1167 = vmatpush.bf16.msrb.mxu3 %v1645_v25  ;;  %v1881_v23 = vor.u32 %v2223_v14, %v1880_v13  ;;  %v2026_v25 = vld [vmem:[#allocation5 + $0x448] sm:$0xf0] }
  0x82   :  { %1155 = vmatpush.bf16.msrb.mxu2 %v2001_v20  ;;  %v2053_v20 = vor.u32 %v2262_v10, %v2050_v11  ;;  %v2029_v30 = vor.u32 %v2256_v24, %v2026_v25  ;;  %v2523_v11 = vld [vmem:[#allocation7] sm:$0x3f] }
  0x83   :  { %1130 = vmatpush.bf16.msrb.mxu0 %v1593_v21  ;;  %v2208_v21 = vld [vmem:[#allocation5 + $0x2b4] sm:$0xf]  ;;  %v228_v13 = vperm.slane %v2523_v11, 0 }
  0x84   :  { %1143 = vmatpush.bf16.msrb.mxu1 %v1785_v26  ;;  %v1525_v26 = vor.u32 %v2130_v18, %v1522_v19  ;;  %v1837_v27 = vor.u32 %v2208_v21, %v1834_v22  ;;  %v2273_v19 = vld [vmem:[#allocation8 + $0x38] sm:$0xff]  ;;  %v2271_v22 = vld [vmem:[#allocation8 + $0x28] sm:$0xff] }
  0x85   :  { %1168 = vmatpush.bf16.msrb.mxu3 %v1621_v37 }
  0x86   :  { %1156 = vmatpush.bf16.msrb.mxu2 %v1977_v32  ;;  %v1810_v32 = vld [vmem:[#allocation5 + $0x298] sm:$0xf0] }
  0x87   :  { %1131 = vmatpush.bf16.msrb.mxu0 %v1569_v33  ;;  %v2250_v33 = vld [vmem:[#allocation5 + $0x404] sm:$0xf]  ;;  %v1813_v36 = vor.u32 %v2202_v31, %v1810_v32  ;;  %v230_v32 = vperm.slane %v2523_v11, 2 }
  0x88   :  { %1144 = vmatpush.bf16.msrb.mxu1 %v1761_v38  ;;  %v2005_v37 = vor.u32 %v2250_v33, %v2002_v34  ;;  %v2196_v38 = vld [vmem:[#allocation5 + $0x254] sm:$0xf] }
  0x89   :  { %1169 = vmatpush.bf16.msrb.mxu3 %v1597_v49  ;;  %v1789_v42 = vor.u32 %v2196_v38, %v1786_v39  ;;  %v1957_v49 = vor.u32 %v2238_v46, %v1954_v47  ;;  %v2268_v33 = vld [vmem:[#allocation8 + $0x10] sm:$0xff]  ;;  %v2267_v38 = vld [vmem:[#allocation8 + $0x8] sm:$0xff] }
  0x8a   :  { %1157 = vmatpush.bf16.msrb.mxu2 %v1953_v44  ;;  %v2190_v44 = vld [vmem:[#allocation5 + $0x224] sm:$0xf] }
  0x8b   :  { %1132 = vmatpush.bf16.msrb.mxu0 %v1545_v45  ;;  %v1762_v45 = vld [vmem:[#allocation5 + $0x238] sm:$0xf0] }
  0x8c   :  { %1145 = vmatpush.bf16.msrb.mxu1 %v1737_v50  ;;  %v1765_v48 = vor.u32 %v2190_v44, %v1762_v45  ;;  %v2184_v50 = vld [vmem:[#allocation5 + $0x1f4] sm:$0xf] }
  0x8d   :  { %1170 = vmatpush.bf16.msrb.mxu3 %v1573_v1  ;;  %v1741_v55 = vor.u32 %v2184_v50, %v1738_v51  ;;  %v1690_v1 = vld [vmem:[#allocation5 + $0x1a8] sm:$0xf0] }
  0x8e   :  { %1158 = vmatpush.bf16.msrb.mxu2 %v1929_v57  ;;  %v2178_v57 = vld [vmem:[#allocation5 + $0x1c4] sm:$0xf]  ;;  %v1693_v4 = vor.u32 %v2172_v0, %v1690_v1  ;;  %v231_v0 = vperm.slane %v2523_v11, 3 }
  0x8f   :  { %1133 = vmatpush.bf16.msrb.mxu0 %v1521_v61  ;;  %v2226_v61 = vld [vmem:[#allocation5 + $0x344] sm:$0xf] }
  0x90   :  { %1146 = vmatpush.bf16.msrb.mxu1 %v1713_v2  ;;  %v1909_v63 = vor.u32 %v2226_v61, %v1906_v62  ;;  %v2220_v2 = vld [vmem:[#allocation5 + $0x314] sm:$0xf] }
  0x91   :  { %1171 = vmatpush.bf16.msrb.mxu3 %v1549_v15  ;;  %v1885_v5 = vor.u32 %v2220_v2, %v1882_v3 }
  0x92   :  { %1159 = vmatpush.bf16.msrb.mxu2 %v1905_v9 }
  0x93   :  { %1134 = vmatpush.bf16.msrb.mxu0 %v1497_v12 }
  0x94   :  { %1147 = vmatpush.bf16.msrb.mxu1 %v1689_v16 }
  0x95   :  { %1172 = vmatpush.bf16.msrb.mxu3 %v1525_v26 }
  0x96   :  { %1160 = vmatpush.bf16.msrb.mxu2 %v1881_v23  ;;  %1135 = vmatmul.bf16.vlgmr.msrb.gmra.mxu0 %v2499_v54 }
  0x97   :  { %1179 = vmatpush.bf16.msra.mxu0 %v1861_v17  ;;  %1148 = vmatmul.bf16.vlgmr.msrb.gmra.mxu1 %v2503_v59 }
  0x98   :  { %1192 = vmatpush.bf16.msra.mxu1 %v2053_v20 }
  0x99   :  { %1161 = vmatmul.bf16.vlgmr.msrb.gmra.mxu2 %v2501_v58  ;;  %1173 = vmatpush.bf16.msrb.mxu3 %v1501_v35 }
  0x9a   :  { %1423 = vmatpush.bf16.msra.mxu2 %v2273_v19 }
  0x9b   :  { %1180 = vmatpush.bf16.msra.mxu0 %v1837_v27  ;;  %v2270_v27 = vld [vmem:[#allocation8 + $0x20] sm:$0xff] }
  0x9c   :  { %1193 = vmatpush.bf16.msra.mxu1 %v2029_v30  ;;  %1174 = vmatmul.bf16.vlgmr.msrb.gmra.mxu3 %v2499_v54  ;;  %v1717_v54 = vor.u32 %v2178_v57, %v1714_v60  ;;  %v2269_v30 = vld [vmem:[#allocation8 + $0x18] sm:$0xff] }
  0x9f   :  { %1181 = vmatpush.bf16.msra.mxu0 %v1813_v36 }
  0xa0   :  { %1194 = vmatpush.bf16.msra.mxu1 %v2005_v37  ;;  %v229_v37 = vperm.slane %v2523_v11, 1 }
  0xa3   :  { %1182 = vmatpush.bf16.msra.mxu0 %v1789_v42  ;;  %v2266_v42 = vld [vmem:[#allocation8] sm:$0xff] }
  0xa4   :  { %1195 = vmatpush.bf16.msra.mxu1 %v1981_v43 }
  0xa7   :  { %1183 = vmatpush.bf16.msra.mxu0 %v1765_v48 }
  0xa8   :  { %1196 = vmatpush.bf16.msra.mxu1 %v1957_v49 }
  0xab   :  { %1184 = vmatpush.bf16.msra.mxu0 %v1741_v55 }
  0xac   :  { %1197 = vmatpush.bf16.msra.mxu1 %v1933_v56 }
  0xaf   :  { %1185 = vmatpush.bf16.msra.mxu0 %v1717_v54 }
  0xb0   :  { %1198 = vmatpush.bf16.msra.mxu1 %v1909_v63 }
  0xb3   :  { %1186 = vmatpush.bf16.msra.mxu0 %v1693_v4  ;;  %v980_v6 = vpop.f32.mrf.mxu0 }
  0xb4   :  { %1199 = vmatpush.bf16.msra.mxu1 %v1885_v5  ;;  %v993_v7 = vpop.f32.mrf.mxu1  ;;  %v981_v15 = vadd.f32 %v980_v6, %v228_v13 }
  0xb6   :  { %1187 = vmatmul.bf16.vlgmr.msra.gmra.mxu0 %v2503_v59  ;;  %v994_v17 = vadd.f32 %v993_v7, %v981_v15 }
  0xb7   :  { %1200 = vmatmul.bf16.vlgmr.msra.gmra.mxu1 %v2501_v58  ;;  %v2272_v58 = vld [vmem:[#allocation8 + $0x30] sm:$0xff] }
  0xb8   :  { %1424 = vmatpush.bf16.msra.mxu2 %v2272_v58 }
  0xbb   :  { %v982_v9 = vpop.f32.mrf.mxu0 }
  0xbc   :  { %v1006_v8 = vpop.f32.mrf.mxu2  ;;  %v995_v10 = vpop.f32.mrf.mxu1  ;;  %1425 = vmatpush.bf16.msra.mxu2 %v2271_v22  ;;  %v2281_v22 = vld [vmem:[#allocation8 + $0x78] sm:$0xff] }
  0xbd   :  { %v1007_v18 = vadd.f32 %v1006_v8, %v994_v17  ;;  %1436 = vmatpush.bf16.msra.mxu3 %v2281_v22 }
  0xbf   :  { %v1019_v12 = vpop.f32.mrf.mxu3  ;;  %v2054_v20 = vmul.f32 -1.442695, %v1007_v18 }
  0xc0   :  { %1426 = vmatpush.bf16.msra.mxu2 %v2270_v27  ;;  %v1020_v41 = vadd.f32 %v1019_v12, %v229_v37 }
  0xc1   :  { %2292 = vpow2.f32 %v2054_v20 }
  0xc4   :  { %v1008_v14 = vpop.f32.mrf.mxu2  ;;  %1427 = vmatpush.bf16.msra.mxu2 %v2269_v30 }
  0xc7   :  { %v1021_v16 = vpop.f32.mrf.mxu3  ;;  %v2293_v26 = vpop.eup %2292 }
  0xc8   :  { %v1208_v29 = vadd.f32 1.0, %v2293_v26  ;;  %1428 = vmatpush.bf16.msra.mxu2 %v2268_v33 }
  0xca   :  { %2294 = vrcp.f32 %v1208_v29  ;;  %vm1214_vm0 = vweird.f32 %v1208_v29  ;;  %v1220_v52 = vand.u32 2147483648, %v1208_v29  ;;  %v1218_v56 = vand.u32 2147483647, %v1208_v29 }
  0xcc   :  { %1429 = vmatpush.bf16.msra.mxu2 %v2267_v38  ;;  %v1221_v62 = vor.u32 1.1754944e-38, %v1220_v52  ;;  %vm1219_vm3 = vcmp.eq.f32.partialorder %v1218_v56, 8.507059e+37  ;;  %v2276_v38 = vld [vmem:[#allocation8 + $0x50] sm:$0xff] }
  0xd0   :  { %v2295_v36 = vpop.eup %2294  ;;  %1430 = vmatpush.bf16.msra.mxu2 %v2266_v42 }
  0xd1   :  { %v1210_v40 = vmul.f32 %v2295_v36, %v1208_v29  ;;  %vm1215_vm1 = vweird.f32 %v2295_v36  ;;  %v2279_v29 = vld [vmem:[#allocation8 + $0x68] sm:$0xff] }
  0xd2   :  { %vm1216_vm2 = vmor %vm1214_vm0, %vm1215_vm1 }
  0xd3   :  { %v1032_v59 = vpop.f32.mrf.mxu0  ;;  %v1211_v45 = vsub.f32 1.0, %v1210_v40 }
  0xd4   :  { %v1045_v21 = vpop.f32.mrf.mxu1  ;;  %v1033_v47 = vadd.f32 %v1032_v59, %v1020_v41  ;;  %v232_v41 = vperm.slane %v2523_v11, 4 }
  0xd5   :  { %v1212_v49 = vmul.f32 %v2295_v36, %v1211_v45 }
  0xd6   :  { %v1046_v50 = vadd.f32 %v1045_v21, %v1033_v47 }
  0xd7   :  { %v1213_v55 = vadd.f32 %v2295_v36, %v1212_v49 }
  0xd9   :  { %v1217_v54 = vsel %vm1216_vm2, %v2295_v36, %v1213_v55  ;;  %v233_v36 = vperm.slane %v2523_v11, 5 }
  0xda   :  { %v1222_v2 = vsel %vm1219_vm3, %v1221_v62, %v1217_v54 }
  0xdb   :  { %v1034_v23 = vpop.f32.mrf.mxu0 }
  0xdc   :  { %v1058_v24 = vpop.f32.mrf.mxu2  ;;  %v1047_v25 = vpop.f32.mrf.mxu1 }
  0xdd   :  { %v1059_v35 = vadd.f32 %v1058_v24, %v230_v32  ;;  %v2280_v25 = vld [vmem:[#allocation8 + $0x70] sm:$0xff]  ;;  %v2278_v32 = vld [vmem:[#allocation8 + $0x60] sm:$0xff] }
  0xde   :  { %1437 = vmatpush.bf16.msra.mxu3 %v2280_v25 }
  0xdf   :  { %v1071_v28 = vpop.f32.mrf.mxu3 }
  0xe0   :  { %v1072_v39 = vadd.f32 %v1071_v28, %v1059_v35  ;;  %v2277_v35 = vld [vmem:[#allocation8 + $0x58] sm:$0xff] }
  0xe2   :  { %1438 = vmatpush.bf16.msra.mxu3 %v2279_v29 }
  0xe4   :  { %v1060_v31 = vpop.f32.mrf.mxu2 }
  0xe6   :  { %1439 = vmatpush.bf16.msra.mxu3 %v2278_v32 }
  0xe7   :  { %v1073_v34 = vpop.f32.mrf.mxu3 }
  0xea   :  { %1440 = vmatpush.bf16.msra.mxu3 %v2277_v35 }
  0xee   :  { %1441 = vmatpush.bf16.msra.mxu3 %v2276_v38 }
  0xf3   :  { %v1084_v43 = vpop.f32.mrf.mxu0 }
  0xf4   :  { %v1085_v44 = vadd.f32 %v1084_v43, %v1072_v39  ;;  %v1097_v46 = vpop.f32.mrf.mxu1  ;;  %v2275_v39 = vld [vmem:[#allocation8 + $0x48] sm:$0xff]  ;;  %v2274_v43 = vld [vmem:[#allocation8 + $0x40] sm:$0xff] }
  0xf5   :  { %v1098_v6 = vadd.f32 %v1097_v46, %v231_v0  ;;  %1442 = vmatpush.bf16.msra.mxu3 %v2275_v39 }
  0xf6   :  { %v2055_v48 = vmul.f32 -1.442695, %v1085_v44 }
  0xf8   :  { %2296 = vpow2.f32 %v2055_v48 }
  0xf9   :  { %2298 = vtanh.f32 %v1046_v50  ;;  %1443 = vmatpush.bf16.msra.mxu3 %v2274_v43 }
  0xfb   :  { %v1086_v51 = vpop.f32.mrf.mxu0 }
  0xfc   :  { %v1110_v53 = vpop.f32.mrf.mxu2  ;;  %v1099_v57 = vpop.f32.mrf.mxu1 }
  0xfd   :  { %v1111_v13 = vadd.f32 %v1110_v53, %v1098_v6 }
  0xfe   :  { %v2297_v60 = vpop.eup %2296 }
  0xff   :  { %v1228_v61 = vadd.f32 1.0, %v2297_v60  ;;  %v1123_v63 = vpop.f32.mrf.mxu3  ;;  %v2299_v1 = vpop.eup %2298 }
 0x100   :  { %v1244_v5 = vmul.f32 %v2299_v1, %v1222_v2  ;;  %v1124_v17 = vadd.f32 %v1123_v63, %v1111_v13 }
 0x101   :  { %2300 = vrcp.f32 %v1228_v61  ;;  %v1240_v8 = vand.u32 2147483648, %v1228_v61  ;;  %vm1234_vm4 = vweird.f32 %v1228_v61  ;;  %v1238_v12 = vand.u32 2147483647, %v1228_v61 }
 0x102   :  { %2302 = vtanh.f32 %v1244_v5  ;;  %v2056_v23 = vmul.f32 -1.442695, %v1124_v17 }
 0x103   :  { %v1241_v15 = vor.u32 1.1754944e-38, %v1240_v8  ;;  %vm1239_vm7 = vcmp.eq.f32.partialorder %v1238_v12, 8.507059e+37 }
 0x104   :  { %v1112_v3 = vpop.f32.mrf.mxu2  ;;  %2304 = vpow2.f32 %v2056_v23 }
 0x107   :  { %v2301_v4 = vpop.eup %2300  ;;  %v1125_v9 = vpop.f32.mrf.mxu3 }
 0x108   :  { %v1230_v7 = vmul.f32 %v2301_v4, %v1228_v61  ;;  %vm1235_vm5 = vweird.f32 %v2301_v4  ;;  %v2303_v20 = vpop.eup %2302 }
 0x109   :  { %vm1236_vm6 = vmor %vm1234_vm4, %vm1235_vm5 }
 0x10a   :  { %v1231_v10 = vsub.f32 1.0, %v1230_v7  ;;  %v2305_v30 = vpop.eup %2304 }
 0x10b   :  { %v1250_v33 = vadd.f32 1.0, %v2305_v30 }
 0x10c   :  { %v1232_v14 = vmul.f32 %v2301_v4, %v1231_v10 }
 0x10d   :  { %2306 = vrcp.f32 %v1250_v33  ;;  %vm1256_vm8 = vweird.f32 %v1250_v33  ;;  %v1262_v11 = vand.u32 2147483648, %v1250_v33  ;;  %v1260_v61 = vand.u32 2147483647, %v1250_v33 }
 0x10e   :  { %v1233_v16 = vadd.f32 %v2301_v4, %v1232_v14 }
 0x10f   :  { %v1263_v63 = vor.u32 1.1754944e-38, %v1262_v11  ;;  %vm1261_vm11 = vcmp.eq.f32.partialorder %v1260_v61, 8.507059e+37 }
 0x110   :  { %v1237_v19 = vsel %vm1236_vm6, %v2301_v4, %v1233_v16 }
 0x111   :  { %v1242_v59 = vsel %vm1239_vm7, %v1241_v15, %v1237_v19 }
 0x112   :  { %v1246_v58 = vmul.f32 %v2303_v20, %v1242_v59  ;;  %v2291_v20 = vld [vmem:[%s2541_s4] ss:$0 sm:$0xff] }
 0x113   :  { %v1136_v18 = vpop.f32.mrf.mxu0  ;;  %v2307_v40 = vpop.eup %2306 }
 0x114   :  { %v1149_v21 = vpop.f32.mrf.mxu1  ;;  %v1289_v24 = vpack.c.bf16 %v1246_v58, %v1246_v58  ;;  %v1252_v44 = vmul.f32 %v2307_v40, %v1250_v33  ;;  %v1137_v46 = vadd.f32 %v1136_v18, %v232_v41  ;;  %vm1257_vm9 = vweird.f32 %v2307_v40 }
 0x115   :  { %vm1258_vm10 = vmor %vm1256_vm8, %vm1257_vm9 }
 0x116   :  { %1431 = vmatmul.bf16.vlgmr.msra.gmra.mxu2 %v1289_v24  ;;  %v1253_v50 = vsub.f32 1.0, %v1252_v44  ;;  %v1150_v51 = vadd.f32 %v1149_v21, %v1137_v46 }
 0x118   :  { %v1254_v53 = vmul.f32 %v2307_v40, %v1253_v50 }
 0x11a   :  { %v1255_v60 = vadd.f32 %v2307_v40, %v1254_v53 }
 0x11b   :  { %v1138_v26 = vpop.f32.mrf.mxu0 }
 0x11c   :  { %v1162_v27 = vpop.f32.mrf.mxu2  ;;  %v1151_v28 = vpop.f32.mrf.mxu1  ;;  %v1259_v0 = vsel %vm1258_vm10, %v2307_v40, %v1255_v60 }
 0x11d   :  { %v1163_v56 = vadd.f32 %v1162_v27, %v1150_v51  ;;  %v1264_v2 = vsel %vm1261_vm11, %v1263_v63, %v1259_v0 }
 0x11f   :  { %v1175_v31 = vpop.f32.mrf.mxu3 }
 0x120   :  { %v1176_v42 = vadd.f32 %v1175_v31, %v233_v36 }
 0x124   :  { %v1164_v34 = vpop.f32.mrf.mxu2 }
 0x127   :  { %v1177_v37 = vpop.f32.mrf.mxu3 }
 0x133   :  { %v1188_v45 = vpop.f32.mrf.mxu0 }
 0x134   :  { %v1189_v47 = vadd.f32 %v1188_v45, %v1176_v42  ;;  %v1201_v48 = vpop.f32.mrf.mxu1 }
 0x136   :  { %v1202_v49 = vadd.f32 %v1201_v48, %v1189_v47 }
 0x138   :  { %v2057_v52 = vmul.f32 -1.442695, %v1202_v49 }
 0x13a   :  { %2308 = vpow2.f32 %v2057_v52 }
 0x13b   :  { %v1190_v55 = vpop.f32.mrf.mxu0  ;;  %2310 = vtanh.f32 %v1163_v56 }
 0x13c   :  { %v1203_v57 = vpop.f32.mrf.mxu1 }
 0x140   :  { %v2309_v62 = vpop.eup %2308 }
 0x141   :  { %v1270_v54 = vadd.f32 1.0, %v2309_v62  ;;  %v2311_v1 = vpop.eup %2310 }
 0x142   :  { %v1286_v4 = vmul.f32 %v2311_v1, %v1264_v2 }
 0x143   :  { %2312 = vrcp.f32 %v1270_v54  ;;  %v1282_v7 = vand.u32 2147483648, %v1270_v54  ;;  %v1280_v9 = vand.u32 2147483647, %v1270_v54  ;;  %vm1276_vm13 = vweird.f32 %v1270_v54 }
 0x144   :  { %2314 = vtanh.f32 %v1286_v4 }
 0x145   :  { %v1283_v12 = vor.u32 1.1754944e-38, %v1282_v7  ;;  %vm1281_vm15 = vcmp.eq.f32.partialorder %v1280_v9, 8.507059e+37 }
 0x149   :  { %v2313_v3 = vpop.eup %2312 }
 0x14a   :  { %v1272_v5 = vmul.f32 %v2313_v3, %v1270_v54  ;;  %vm1277_vm12 = vweird.f32 %v2313_v3  ;;  %v2315_v14 = vpop.eup %2314 }
 0x14b   :  { %vm1278_vm14 = vmor %vm1276_vm13, %vm1277_vm12 }
 0x14c   :  { %v1273_v6 = vsub.f32 1.0, %v1272_v5 }
 0x14e   :  { %v1274_v8 = vmul.f32 %v2313_v3, %v1273_v6 }
 0x150   :  { %v1275_v10 = vadd.f32 %v2313_v3, %v1274_v8 }
 0x152   :  { %v1279_v13 = vsel %vm1278_vm14, %v2313_v3, %v1275_v10 }
 0x153   :  { %v1284_v15 = vsel %vm1281_vm15, %v1283_v12, %v1279_v13 }
 0x154   :  { %v1288_v16 = vmul.f32 %v2315_v14, %v1284_v15 }
 0x156   :  { %v1290_v17 = vpack.c.bf16 %v1288_v16, %v1288_v16 }
 0x158   :  { %1444 = vmatmul.bf16.vlgmr.msra.gmra.mxu3 %v1290_v17 }
 0x199   :  { %v1432_v18 = vpop.f32.mrf.mxu2 }
 0x19a   :  { %v1433_v59 = vadd.f32 %v2291_v20, %v1432_v18 }
 0x1a1   :  { %v1434_v19 = vpop.f32.mrf.mxu2 }
 0x1db   :  { %v1445_v21 = vpop.f32.mrf.mxu3 }
 0x1dc   :  { %v1446_v58 = vadd.f32 %v1445_v21, %v1433_v59 }
 0x1de   :  { %1449 = vmax.xlane.f32.xlu0 %v1446_v58 }
 0x1e3   :  { %v1447_v22 = vpop.f32.mrf.mxu3 }
 0x251   :  { %v1450_v23 = vpop.xlane.xlu0 %1449 }
 0x252   :  { %v1451_v24 = vsub.f32 %v1446_v58, %v1450_v23 }
 0x254   :  { %v1452_v25 = vmul.f32 1.442695, %v1451_v24 }
 0x256   :  { %2316 = vpow2.f32 %v1452_v25 }
 0x25c   :  { %v2317_v26 = vpop.eup %2316 }
 0x25d   :  { %1454 = vadd.xlane.f32.xlu0 %v2317_v26 }
 0x2d0   :  { %v1455_v27 = vpop.xlane.xlu0 %1454 }
 0x2d1   :  { %2318 = vrcp.f32 %v1455_v27 }
 0x2d7   :  { %v2319_v28 = vpop.eup %2318 }
 0x2d8   :  { %v1457_v29 = vmul.f32 %v2319_v28, %v2317_v26 }
 0x2da   :  { %1458 = vst [vmem:[#allocation10] sm:$0xff] %v1457_v29 }
 0x2db   :  { %1469 = dma.vmem_to_hbm [thread:$0]  %s1465_s16, 128, %s1467_s19, [#allocation4]  }
 0x2dc   :  { %2446 = dma.done.wait [#allocation4], 128  }
 0x2dd   :  { %2447 = vsyncadd [#allocation4], 4294967168 }
 0x2de   :  { %1474 = vsyncpa [#allocation3], 1 }
 0x2df   :  { %1475 = vsyncpa [#allocation6], 1 }
 0x2e0   :  { %1476 = vsyncpa [#allocation9], 1 }
 0x2e1   :  { %1477 = vsyncpa [#allocation4], 1 }

</bundles_post_ra>
